<compile_context>
chip_gen: v7x
topology: tpu7x:2x2x1
jax: 0.10.0
libtpu: 0.0.40
codegen_flags: <defaults>
</compile_context>

<pallas_src>
import functools

import jax
import jax.numpy as jnp
from jax.experimental import pallas as pl
from jax.experimental.pallas import tpu as pltpu


def _round_up(x, m):
    return ((x + m - 1) // m) * m


# ---------------------------------------------------------------------------
# Kernels
# ---------------------------------------------------------------------------
def _dense_kernel(x_ref, w_ref, b_ref, o_ref):
    # Unsplit-K path.  x_ref: (tm, K) bf16, w_ref: (K, tn) bf16,
    # b_ref: (1, tn) f32, o_ref: (tm, tn) out_dtype.
    y = jnp.dot(x_ref[...], w_ref[...], preferred_element_type=jnp.float32)
    y = y + b_ref[...]                      # bias broadcast over rows, f32
    # dropout (eval mode) == identity
    o_ref[...] = jnp.tanh(y).astype(o_ref.dtype)


def _dense_kernel_ksplit(x_ref, w_ref, b_ref, o_ref, acc_ref):
    # K-split path (only used when the unsplit tiles exceed the VMEM budget).
    k = pl.program_id(2)

    @pl.when(k == 0)
    def _():
        acc_ref[...] = jnp.zeros_like(acc_ref)

    acc_ref[...] += jnp.dot(x_ref[...], w_ref[...],
                            preferred_element_type=jnp.float32)

    @pl.when(k == pl.num_programs(2) - 1)
    def _():
        y = acc_ref[...] + b_ref[...]
        o_ref[...] = jnp.tanh(y).astype(o_ref.dtype)


# ---------------------------------------------------------------------------
# One-time parameter preparation (do NOT redo this per forward call)
# ---------------------------------------------------------------------------
def prepare_dense_params(weight, bias, *, compute_dtype=jnp.bfloat16):
    """Convert torch-layout Linear params for the kernel, once.

    weight: (output_dim, input_dim) -> (K, Np) compute_dtype, pre-transposed
            and padded so output_dim is rounded up to a 128-multiple.
    bias:   (output_dim,)           -> (1, Np) f32.
    Returns (wp, bp, output_dim).
    """
    out_dim, in_dim = weight.shape
    n_pad = _round_up(out_dim, 128)
    wp = jnp.pad(weight.T, ((0, 0), (0, n_pad - out_dim))).astype(compute_dtype)
    bp = jnp.pad(bias.astype(jnp.float32), (0, n_pad - out_dim)).reshape(1, n_pad)
    return wp, bp, out_dim


# ---------------------------------------------------------------------------
# Tile selection helpers
# ---------------------------------------------------------------------------
def _vmem_budget_bytes():
    try:
        cap = int(pltpu.get_tpu_info().vmem_capacity_bytes)
    except Exception:
        cap = 64 << 20          # v7x physical size: conservative default
    return (cap * 3) // 4       # headroom for compiler-internal scratch


def _footprint_bytes(tm, tk, tn, in_itemsize, out_itemsize, ksplit):
    fp = 2 * tm * tk * in_itemsize        # x tile, double-buffered
    fp += 2 * tk * tn * in_itemsize       # w tile, double-buffered
    fp += 2 * tn * 4                      # bias tile
    fp += 2 * tm * tn * out_itemsize      # out tile, double-buffered
    if ksplit:
        fp += tm * tn * 4                 # f32 accumulator scratch
    return fp


# ---------------------------------------------------------------------------
# Forward wrapper
# ---------------------------------------------------------------------------
def dense_forward(x, wp, bp, n_out=None, *, tm=512, tn=256,
                  out_dtype=jnp.float32, vmem_budget_bytes=None):
    """y[:, :n_out] = tanh(dropout(x @ W^T + b)), dropout in eval mode.

    x  : (M, K) activations (cast to wp.dtype only if needed).
    wp : (K, Np) pre-transposed / pre-padded weight from prepare_dense_params.
    bp : (1, Np) f32 bias.
    """
    M, K = x.shape
    Kw, Np = wp.shape
    assert K == Kw, "weight must be prepared as (input_dim, padded_output_dim)"
    assert Np % 128 == 0, "use prepare_dense_params to pad the weight"
    if n_out is None:
        n_out = Np

    compute_dtype = wp.dtype
    in_itemsize = jnp.dtype(compute_dtype).itemsize
    out_itemsize = jnp.dtype(out_dtype).itemsize
    row_granule = 16 if in_itemsize == 2 else 8   # bf16 packs (16, 128) vregs

    # --- tile selection vs VMEM budget --------------------------------------
    budget = vmem_budget_bytes if vmem_budget_bytes else _vmem_budget_bytes()

    tn = max(128, min(tn, Np))
    while Np % tn:
        tn -= 128

    if M <= tm:
        tm = _round_up(M, row_granule)
    tm = _round_up(tm, row_granule)

    tk = K
    while (tm > 256 and
           _footprint_bytes(tm, tk, tn, in_itemsize, out_itemsize, False) > budget):
        tm //= 2

    ksplit = (K % 128 == 0 and
              _footprint_bytes(tm, tk, tn, in_itemsize, out_itemsize, False) > budget)
    if ksplit:
        tk = 128
        for d in range(K, 127, -128):
            if K % d == 0 and _footprint_bytes(
                    tm, d, tn, in_itemsize, out_itemsize, True) <= budget:
                tk = d
                break

    Mp = _round_up(M, tm)
    grid_m, grid_n = Mp // tm, Np // tn
    grid_k = (K // tk) if ksplit else 1

    # --- activations: cast only if needed, pad rows only as far as required --
    xp = x if x.dtype == compute_dtype else x.astype(compute_dtype)
    if Mp != M:
        xp = jnp.pad(xp, ((0, Mp - M), (0, 0)))

    # --- cost estimate (weight re-streamed grid_m times; x resident per row
    #     stripe in the unsplit path, re-streamed grid_n times when K split) --
    x_passes = grid_n if ksplit else 1
    cost = pl.CostEstimate(
        flops=2 * Mp * K * Np,
        transcendentals=Mp * Np,
        bytes_accessed=(x_passes * Mp * K * in_itemsize
                        + grid_m * K * Np * in_itemsize
                        + grid_m * Np * 4
                        + Mp * Np * out_itemsize),
    )

    footprint = _footprint_bytes(tm, tk, tn, in_itemsize, out_itemsize, ksplit)
    vmem_limit = min(max(footprint + (8 << 20), 32 << 20), 128 << 20)
    compiler_params = pltpu.CompilerParams(
        dimension_semantics=(("parallel", "parallel", "arbitrary") if ksplit
                             else ("parallel", "parallel")),
        vmem_limit_bytes=vmem_limit,
    )

    if ksplit:
        grid_spec = pltpu.PrefetchScalarGridSpec(
            num_scalar_prefetch=0,
            grid=(grid_m, grid_n, grid_k),
            in_specs=[
                pl.BlockSpec((tm, tk), lambda i, j, k: (i, k)),   # x tile
                pl.BlockSpec((tk, tn), lambda i, j, k: (k, j)),   # weight tile
                pl.BlockSpec((1, tn), lambda i, j, k: (0, j)),    # bias tile
            ],
            out_specs=pl.BlockSpec((tm, tn), lambda i, j, k: (i, j)),
            scratch_shapes=[pltpu.VMEM((tm, tn), jnp.float32)],
        )
        kernel = _dense_kernel_ksplit
    else:
        grid_spec = pltpu.PrefetchScalarGridSpec(
            num_scalar_prefetch=0,
            grid=(grid_m, grid_n),
            in_specs=[
                pl.BlockSpec((tm, K), lambda i, j: (i, 0)),       # x row tile
                pl.BlockSpec((K, tn), lambda i, j: (0, j)),       # weight col tile
                pl.BlockSpec((1, tn), lambda i, j: (0, j)),       # bias col tile
            ],
            out_specs=pl.BlockSpec((tm, tn), lambda i, j: (i, j)),
        )
        kernel = _dense_kernel

    out_padded = pl.pallas_call(
        kernel,
        out_shape=jax.ShapeDtypeStruct((Mp, Np), out_dtype),
        grid_spec=grid_spec,
        compiler_params=compiler_params,
        cost_estimate=cost,
    )(xp, wp, bp)

    # Padded rows/cols hold tanh(b) != 0; the slice keeps correctness.
    if Mp == M and Np == n_out:
        return out_padded
    return out_padded[:M, :n_out]


def xavier_uniform(key, out_dim, in_dim, dtype=jnp.float32):
    """Matches torch.nn.init.xavier_uniform_ for a (out_dim, in_dim) weight."""
    limit = jnp.sqrt(6.0 / (in_dim + out_dim))
    return jax.random.uniform(
        key, (out_dim, in_dim), dtype=dtype, minval=-limit, maxval=limit
    )


if __name__ == "__main__":
    input_dim = 32
    output_dim = 64
    batch = 16
    dropout_rate = 0.1  # identity in eval mode

    key = jax.random.PRNGKey(0)
    kx, kw, kb = jax.random.split(key, 3)

    x = jax.random.normal(kx, (batch, input_dim), dtype=jnp.float32)

    # nn.Linear weight is (output_dim, input_dim); xavier-uniform init.
    w_torch_layout = xavier_uniform(kw, output_dim, input_dim)
    # nn.Linear default bias init: U(-1/sqrt(fan_in), 1/sqrt(fan_in))
    bound = 1.0 / jnp.sqrt(jnp.float32(input_dim))
    b = jax.random.uniform(
        kb, (output_dim,), dtype=jnp.float32, minval=-bound, maxval=bound
    )

    # One-time weight preparation (transpose, pad N to 128-multiple, cast bf16).
    wp, bp, n_out = prepare_dense_params(w_torch_layout, b)

    fwd = jax.jit(functools.partial(dense_forward, n_out=n_out))
    out = jax.block_until_ready(fwd(x, wp, bp))

    # Reference in plain JAX (f32).  Kernel uses bf16 MXU operands with f32
    # accumulation, so the tolerance is loosened accordingly.
    ref = jnp.tanh(x @ w_torch_layout.T + b)
    assert out.shape == (batch, output_dim)
    assert jnp.allclose(out, ref, atol=3e-2, rtol=0.0), (
        float(jnp.max(jnp.abs(out - ref)))
    )

    print("KERNEL_OK")
</pallas_src>

<mosaic_0001>
module attributes {stable_mosaic.version = 11 : i64} {
  func.func @_dense_kernel(%arg0: i32, %arg1: i32, %arg2: memref<16x32xbf16, #tpu.memory_space<vmem>>, %arg3: memref<32x128xbf16, #tpu.memory_space<vmem>>, %arg4: memref<1x128xf32, #tpu.memory_space<vmem>>, %arg5: memref<16x128xf32, #tpu.memory_space<vmem>>) attributes {dimension_semantics = [#tpu.dimension_semantics<parallel>, #tpu.dimension_semantics<parallel>], iteration_bounds = array<i64: 1, 1>, scalar_prefetch = 0 : i64, scratch_operands = 0 : i64, tpu.core_type = #tpu.core_type<tc>, window_params = [{transform_indices = @transform_0, window_bounds = array<i64: 16, 32>}, {transform_indices = @transform_1, window_bounds = array<i64: 32, 128>}, {transform_indices = @transform_2, window_bounds = array<i64: 1, 128>}, {transform_indices = @transform_3, window_bounds = array<i64: 16, 128>}]} {
    %c0 = arith.constant 0 : index
    %c0_0 = arith.constant 0 : index
    %0 = vector.load %arg2[%c0, %c0_0] : memref<16x32xbf16, #tpu.memory_space<vmem>>, vector<16x32xbf16>
    %c0_1 = arith.constant 0 : index
    %c0_2 = arith.constant 0 : index
    %1 = vector.load %arg3[%c0_1, %c0_2] : memref<32x128xbf16, #tpu.memory_space<vmem>>, vector<32x128xbf16>
    %cst = arith.constant dense<0.000000e+00> : vector<16x128xf32>
    %2 = tpu.matmul %0, %1, %cst {dimension_numbers = #tpu.dot_dimension_numbers<[1], [0], [0], [1], [0, 0, 1, 1], [], []>} : vector<16x32xbf16>, vector<32x128xbf16>, vector<16x128xf32> -> vector<16x128xf32>
    %c0_3 = arith.constant 0 : index
    %c0_4 = arith.constant 0 : index
    %3 = vector.load %arg4[%c0_3, %c0_4] : memref<1x128xf32, #tpu.memory_space<vmem>>, vector<1x128xf32>
    %4 = vector.broadcast %3 : vector<1x128xf32> to vector<16x128xf32>
    %5 = arith.addf %2, %4 : vector<16x128xf32>
    %6 = math.tanh %5 : vector<16x128xf32>
    %c0_5 = arith.constant 0 : index
    %c0_6 = arith.constant 0 : index
    %7 = vector.load %arg5[%c0_5, %c0_6] : memref<16x128xf32, #tpu.memory_space<vmem>>, vector<16x128xf32>
    tpu.vector_store %arg5[%c0_5, %c0_6], %6 {strides = array<i32>} : memref<16x128xf32, #tpu.memory_space<vmem>>, vector<16x128xf32>,
    return
  }
  func.func @transform_0(%arg0: i32, %arg1: i32) -> (i32, i32) {
    %c0_i32 = arith.constant 0 : i32
    %c0_i32_0 = arith.constant 0 : i32
    return %arg0, %c0_i32 : i32, i32
  }
  func.func @transform_1(%arg0: i32, %arg1: i32) -> (i32, i32) {
    %c0_i32 = arith.constant 0 : i32
    %c0_i32_0 = arith.constant 0 : i32
    return %c0_i32, %arg1 : i32, i32
  }
  func.func @transform_2(%arg0: i32, %arg1: i32) -> (i32, i32) {
    %c0_i32 = arith.constant 0 : i32
    %c0_i32_0 = arith.constant 0 : i32
    return %c0_i32, %arg1 : i32, i32
  }
  func.func @transform_3(%arg0: i32, %arg1: i32) -> (i32, i32) {
    %c0_i32 = arith.constant 0 : i32
    return %arg0, %arg1 : i32, i32
  }
}

</mosaic_0001>

<bundles_post_ra>
// kernel: dense_forward.1
= control target key start
LH: loop header
LB: loop body
LE: loop exit
PB: predicated region body
PF: predicated region fallthrough
CT: control target
= control target key end

     0   :  { %v163_v1 = vmov 0.0   ;;  %vm164_vm0 = vmmov 0   ;;  %s212_s0 = inlined_call_operand.vmem [shape: bf16[16,32], index: 0, kind: input, shape index: {}]   ;;  %s213_s1 = inlined_call_operand.vmem [shape: bf16[32,128], index: 1, kind: input, shape index: {}]   ;;  %s214_s2 = inlined_call_operand.vmem [shape: f32[1,128], index: 2, kind: input, shape index: {}]   ;;  %s215_s3 = inlined_call_operand.hbm [shape: f32[16,128], index: 3, kind: output, shape index: {}]  }
   0x1   :  { %v132_v0 = vld [vmem:[%s213_s1] sm:$0xff]   ;;  %119 = vmatprep.subr.bf16.mxu0 %v163_v1  ;;  %v133_v2 = vld [vmem:[%s213_s1 + $0x8] sm:$0xff]   ;;  %123 = vmatprep.mubr.msk.bf16.mxu0 %vm164_vm0, %v163_v1 }
   0x2   :  { %120 = vmatpush3.bf16.msra.mxu0 %v132_v0 }
   0x3   :  { %121 = vmatprep.subr.bf16.mxu0 %v163_v1 }
   0x4   :  { %8 = vsyncpa [#allocation3], 0  ;;  %v134_v3 = vld [vmem:[%s212_s0] sm:$0xff]   ;;  %vm46_vm1 = vcmask 261120   ;;  %s165_s1 = smov [#allocation2]  }
   0x5   :  { %v111_v4 = vld [vmem:[%s214_s2] ss:$0 sm:$0xff]  ;;  %s100_s20 = sshll.u32 %s165_s1, 4  ;;  %s101_s20 = int_to_ptr.vmem [resolvable:$true] %s100_s20 }
   0x6   :  { %122 = vmatpush3.bf16.msra.mxu0 %v133_v2  ;;  %s139_s0 = scalar_lea.vmem %s101_s20, 256  ;;  %p144_p1 = scmp.lt.s32.totalorder %s101_s20, %s101_s20 }
   0x7   :  { %p140_p0 = scmp.ne.s32.totalorder %s101_s20, %s139_s0  ;;  %p145_p2 = scmp.lt.s32.totalorder %s139_s0, %s139_s0 }
   0x9   :  { %124 = vmatmul.mubr.msk.bf16.vlgmr.msra.gmra.mrb[0].mxu0 %vm46_vm1, %v134_v3  ;;  %p146_p3 = por %p145_p2, %p144_p1 }
   0xb   :  { %p147_p4 = pnand %p146_p3, %p140_p0 }
  0xdc   :  { %v84_v5 = vpop.f32.mrb[0].mxu0 }
  0xdd   :  { %v85_v6 = vadd.f32 %v111_v4, %v84_v5  ;;  %v125_v7 = vpop.f32.mrb[1].mxu0 }
  0xde   :  { %v87_v8 = vpop.f32.mrb[2].mxu0 }
  0xdf   :  { %135 = vtanh.f32 %v85_v6  ;;  %v88_v9 = vadd.f32 %v111_v4, %v87_v8  ;;  %v126_v10 = vpop.f32.mrb[3].mxu0 }
  0xe1   :  { %137 = vtanh.f32 %v88_v9 }
  0xe9   :  { %v136_v11 = vpop.eup %135 }
  0xea   :  { %93 = vst [vmem:[#allocation2] sm:$0xff] %v136_v11 }
  0xeb   :  { %v138_v12 = vpop.eup %137 }
  0xec   :  { %94 = vst [vmem:[#allocation2 + $0x8] sm:$0xff] %v138_v12 }
  0xed   :  { %150 = shalt.err (!%p147_p4)
}
  0xee   :  { %s151_s22 = scalar_lea.hbm %s215_s3, 256 }
  0xef   :  { %p152_p5 = scmp.ne.s32.totalorder %s215_s3, %s151_s22  ;;  %p155_p6 = scmp.lt.u32.totalorder %s151_s22, %s215_s3 }
  0xf1   :  { %p157_p7 = pnand %p155_p6, %p152_p5 }
  0xf3   :  { %160 = shalt.err (!%p157_p7)
}
  0xf4   :  { %s166_s27 = smov 128   ;;  %s167_s28 = smov 8  }
  0xf5   :  { %106 = dma.vmem_to_hbm [thread:$0]  %s101_s20, 256, %s215_s3, [#allocation3], %s166_s27, %s166_s27, %s167_s28  }
  0xf6   :  { %161 = dma.done.wait [#allocation3], 256  }
  0xf7   :  { %162 = vsyncadd [#allocation3], 4294967040 }
  0xf8   :  { %110 = vsyncpa [#allocation3], 1 }

</bundles_post_ra>
